<compile_context>
chip_gen: v5e
topology: v5e:2x2
jax: 0.10.0
libtpu: 0.0.40
codegen_flags: <defaults>
</compile_context>

<pallas_src>
import functools

import jax
import jax.numpy as jnp
from jax.experimental import pallas as pl
from jax.experimental.pallas import tpu as pltpu


# ---------------------------------------------------------------------------
# Squeeze / excite MLP shared by both kernels.
# ---------------------------------------------------------------------------
def _squeeze_excite(pooled, w1, b1, w2, b2, *, use_mxu):
    """pooled: (nb, C) f32  ->  sigmoid gate (nb, C) f32."""
    if use_mxu:
        h = jax.lax.dot_general(pooled, w1, (((1,), (1,)), ((), ())),
                                preferred_element_type=jnp.float32)
        h = jnp.maximum(h + b1, 0.0)
        y = jax.lax.dot_general(h, w2, (((1,), (1,)), ((), ())),
                                preferred_element_type=jnp.float32)
    else:
        # Tiny matvec (e.g. 2x32): keep it on the VPU/XLU, off the MXU.
        h = jnp.sum(pooled[:, None, :] * w1[None, :, :], axis=-1)
        h = jnp.maximum(h + b1, 0.0)
        y = jnp.sum(h[:, None, :] * w2[None, :, :], axis=-1)
    return jax.nn.sigmoid(y + b2)


# ---------------------------------------------------------------------------
# Fused single-pass kernel: whole (nb, C, HW) block resident in VMEM.
# ---------------------------------------------------------------------------
def _ca_fused_kernel(x_ref, w1_ref, b1_ref, w2_ref, b2_ref, out_ref, *,
                     inv_hw, use_mxu):
    # AdaptiveAvgPool2d(1): f32-accumulated sum over spatial lanes / true HW.
    pooled = jnp.sum(x_ref[...], axis=-1, dtype=jnp.float32) * inv_hw        # (nb, C)
    y = _squeeze_excite(pooled, w1_ref[...], b1_ref[...], w2_ref[...],
                        b2_ref[...], use_mxu=use_mxu)                        # (nb, C)
    # Re-read x_ref instead of keeping the whole tile live across the MLP
    # (vld slots have slack; avoids vreg spills on multi-MiB blocks).
    out_ref[...] = x_ref[...] * y[:, :, None].astype(out_ref.dtype)


# ---------------------------------------------------------------------------
# Spatial-tiled two-pass kernel: pass 0 pools over HW tiles, pass 1 re-reads x
# and applies the gate. Used only when one (1, C, HW) block exceeds the budget.
# ---------------------------------------------------------------------------
def _ca_tiled_kernel(x_ref, w1_ref, b1_ref, w2_ref, b2_ref, out_ref,
                     pooled_ref, y_ref, *,
                     inv_hw, hw, hw_blk, mask_tail, use_mxu):
    p = pl.program_id(1)          # 0: pooling pass, 1: scaling pass
    h = pl.program_id(2)
    nh = pl.num_programs(2)

    @pl.when((p == 0) & (h == 0))
    def _init():
        pooled_ref[...] = jnp.zeros_like(pooled_ref)

    @pl.when(p == 0)
    def _pool():
        x = x_ref[...]
        if mask_tail:
            # Last HW block is padded with undefined values; mask before summing.
            lane = jax.lax.broadcasted_iota(jnp.int32, x.shape, 2)
            valid = hw - h * hw_blk           # only < hw_blk on the last block
            x = jnp.where(lane < valid, x, jnp.zeros_like(x))
        pooled_ref[...] += jnp.sum(x, axis=-1, dtype=jnp.float32)

    @pl.when((p == 0) & (h == nh - 1))
    def _mlp():
        y_ref[...] = _squeeze_excite(pooled_ref[...] * inv_hw,
                                     w1_ref[...], b1_ref[...],
                                     w2_ref[...], b2_ref[...],
                                     use_mxu=use_mxu)

    @pl.when(p == 1)
    def _scale():
        out_ref[...] = x_ref[...] * y_ref[...][:, :, None].astype(out_ref.dtype)


# ---------------------------------------------------------------------------
# Wrapper.
# ---------------------------------------------------------------------------
def _vmem_limit_bytes():
    """Generation-aware scoped-VMEM limit: ~75% of physical capacity."""
    cap = None
    try:
        info = pltpu.get_tpu_info()
        for name in ("vmem_capacity_bytes", "vmem_bytes", "vmem_size_bytes"):
            cap = getattr(info, name, None)
            if cap:
                break
    except Exception:
        cap = None
    if not cap:
        cap = 64 * 1024 * 1024            # conservative: v7x has 64 MiB / TC
    return int(cap) * 3 // 4              # ~48 MiB on v7x, ~96 MiB on v5e/v6e


def _x_in_spec(block_shape, index_map, bufs):
    """Input BlockSpec with optional deeper pipelining."""
    if bufs > 2 and hasattr(pl, "Buffered"):
        try:
            return pl.BlockSpec(block_shape, index_map,
                                pipeline_mode=pl.Buffered(bufs))
        except TypeError:                  # older BlockSpec signature
            pass
    return pl.BlockSpec(block_shape, index_map)


def channel_attention(x_nchw, w1, b1, w2, b2, *,
                      block_bytes=4 * 1024 * 1024, donate_x=False):
    """RCAN ChannelAttention forward: x * sigmoid(conv2(relu(conv1(avgpool(x)))))."""
    N, C, H, W = x_nchw.shape
    C_sq = w1.shape[0]
    HW = H * W
    itemsize = jnp.dtype(x_nchw.dtype).itemsize

    # Free collapse of contiguous trailing dims — no pad, no copy.
    x = x_nchw.reshape(N, C, HW)

    w1c = w1.reshape(C_sq, C).astype(jnp.float32)
    b1c = b1.reshape(1, C_sq).astype(jnp.float32)
    w2c = w2.reshape(C, C_sq).astype(jnp.float32)
    b2c = b2.reshape(1, C).astype(jnp.float32)
    weight_bytes = (w1c.size + b1c.size + w2c.size + b2c.size) * 4

    vmem_limit = _vmem_limit_bytes()
    vmem_budget = int(vmem_limit * 0.7)            # headroom for weights/scratch
    per_n_bytes = C * HW * itemsize
    # Blocks only need to be a few MiB to saturate the HBM roofline; oversizing
    # just reduces step count (worse pipelining / v7x load balance).
    max_block = max(1, min(block_bytes, vmem_budget // 5))

    inv_hw = 1.0 / float(HW)
    use_mxu = C >= 128
    io_alias = {0: 0} if donate_x else {}

    if per_n_bytes <= max_block:
        # -------- fused single-pass path: x read once, written once ---------
        min_steps = min(N, 8)                       # >= ~4 steps per v7x core
        target_nb = min(N,
                        max(1, max_block // per_n_bytes),
                        max(1, N // min_steps))
        nb = max(d for d in range(1, target_nb + 1) if N % d == 0)
        grid_n = N // nb
        blk_bytes = nb * per_n_bytes
        in_bufs = 3 if (grid_n >= 3 and
                        (3 + 2) * blk_bytes + weight_bytes <= vmem_budget) else 2

        kernel = functools.partial(_ca_fused_kernel, inv_hw=inv_hw,
                                   use_mxu=use_mxu)
        cost = pl.CostEstimate(
            flops=int(2 * N * C * HW + 4 * N * C * C_sq),
            transcendentals=int(N * C),
            bytes_accessed=int(2 * N * C * HW * itemsize + weight_bytes))

        out = pl.pallas_call(
            kernel,
            out_shape=jax.ShapeDtypeStruct((N, C, HW), x.dtype),
            grid_spec=pltpu.PrefetchScalarGridSpec(
                num_scalar_prefetch=0,
                grid=(grid_n,),
                in_specs=[
                    _x_in_spec((nb, C, HW), lambda n: (n, 0, 0), in_bufs),
                    pl.BlockSpec((C_sq, C), lambda n: (0, 0)),
                    pl.BlockSpec((1, C_sq), lambda n: (0, 0)),
                    pl.BlockSpec((C, C_sq), lambda n: (0, 0)),
                    pl.BlockSpec((1, C), lambda n: (0, 0)),
                ],
                out_specs=pl.BlockSpec((nb, C, HW), lambda n: (n, 0, 0)),
            ),
            compiler_params=pltpu.CompilerParams(
                dimension_semantics=("parallel",),
                vmem_limit_bytes=vmem_limit),
            cost_estimate=cost,
            input_output_aliases=io_alias,
        )(x, w1c, b1c, w2c, b2c)
    else:
        # -------- spatial-tiled two-pass path (large feature maps) ----------
        nb = 1
        hw_blk = max(128, (max_block // (C * itemsize)) // 128 * 128)
        hw_blk = min(hw_blk, ((HW + 127) // 128) * 128)
        # TODO(synk): tile the channel axis too if C*128*itemsize alone exceeds
        # the VMEM budget (not needed for RCAN-sized channel counts).
        grid_hw = pl.cdiv(HW, hw_blk)
        mask_tail = (HW % hw_blk) != 0

        kernel = functools.partial(_ca_tiled_kernel, inv_hw=inv_hw, hw=HW,
                                   hw_blk=hw_blk, mask_tail=mask_tail,
                                   use_mxu=use_mxu)
        cost = pl.CostEstimate(
            flops=int(3 * N * C * HW + 4 * N * C * C_sq),
            transcendentals=int(N * C),
            bytes_accessed=int(3 * N * C * HW * itemsize + weight_bytes))

        out = pl.pallas_call(
            kernel,
            out_shape=jax.ShapeDtypeStruct((N, C, HW), x.dtype),
            grid_spec=pltpu.PrefetchScalarGridSpec(
                num_scalar_prefetch=0,
                grid=(N, 2, grid_hw),
                in_specs=[
                    pl.BlockSpec((nb, C, hw_blk), lambda n, p, h: (n, 0, h)),
                    pl.BlockSpec((C_sq, C), lambda n, p, h: (0, 0)),
                    pl.BlockSpec((1, C_sq), lambda n, p, h: (0, 0)),
                    pl.BlockSpec((C, C_sq), lambda n, p, h: (0, 0)),
                    pl.BlockSpec((1, C), lambda n, p, h: (0, 0)),
                ],
                # During the pooling pass the output block index is pinned to 0,
                # so nothing is written back until the scaling pass rewrites it.
                out_specs=pl.BlockSpec((nb, C, hw_blk),
                                       lambda n, p, h: (n, 0, h * p)),
                scratch_shapes=[pltpu.VMEM((nb, C), jnp.float32),   # pooled acc
                                pltpu.VMEM((nb, C), jnp.float32)],  # gate y
            ),
            compiler_params=pltpu.CompilerParams(
                dimension_semantics=("parallel", "arbitrary", "arbitrary"),
                vmem_limit_bytes=vmem_limit),
            cost_estimate=cost,
            input_output_aliases=io_alias,
        )(x, w1c, b1c, w2c, b2c)

    return out.reshape(N, C, H, W)


# ---------------------------------------------------------------------------
# Pure-JAX reference matching the PyTorch module.
# ---------------------------------------------------------------------------
def _reference(x, w1, b1, w2, b2):
    N, C, H, W = x.shape
    C_sq = w1.shape[0]
    hp = jax.lax.Precision.HIGHEST
    pooled = jnp.mean(x.astype(jnp.float32), axis=(2, 3))                    # (N, C)
    h = jnp.maximum(
        jnp.matmul(pooled, w1.reshape(C_sq, C).T.astype(jnp.float32),
                   precision=hp) + b1.astype(jnp.float32), 0.0)
    y = jax.nn.sigmoid(
        jnp.matmul(h, w2.reshape(C, C_sq).T.astype(jnp.float32),
                   precision=hp) + b2.astype(jnp.float32))
    return x * y[:, :, None, None].astype(x.dtype)


if __name__ == "__main__":
    key = jax.random.PRNGKey(0)
    kx, k1, k2, k3, k4, k5 = jax.random.split(key, 6)

    # num_feat=32, squeeze_factor=16 -> squeezed channels = 2
    N, C, H, W = 2, 32, 16, 16
    C_sq = C // 16
    x = jax.random.normal(kx, (N, C, H, W), dtype=jnp.float32)
    # Parameter shapes per nn.Conv2d(C, C_sq, 1) / nn.Conv2d(C_sq, C, 1).
    w1 = jax.random.normal(k1, (C_sq, C, 1, 1), dtype=jnp.float32) * 0.1
    b1 = jax.random.normal(k2, (C_sq,), dtype=jnp.float32) * 0.1
    w2 = jax.random.normal(k3, (C, C_sq, 1, 1), dtype=jnp.float32) * 0.1
    b2 = jax.random.normal(k4, (C,), dtype=jnp.float32) * 0.1

    # 1) Fused single-pass path.
    out = jax.block_until_ready(channel_attention(x, w1, b1, w2, b2))
    assert out.shape == x.shape
    assert jnp.allclose(out, _reference(x, w1, b1, w2, b2),
                        atol=2e-5, rtol=2e-5), "fused path mismatch"

    # 2) Fused path with ragged spatial (HW=49) and odd batch — no padding anywhere.
    x2 = jax.random.normal(kx, (3, C, 7, 7), dtype=jnp.float32)
    out2 = jax.block_until_ready(channel_attention(x2, w1, b1, w2, b2))
    assert jnp.allclose(out2, _reference(x2, w1, b1, w2, b2),
                        atol=2e-5, rtol=2e-5), "fused ragged-HW mismatch"

    # 3) Spatial-tiled two-pass path (forced via a tiny block budget); HW=300
    #    exercises multi-tile pooling plus the masked tail block (300 = 2*128 + 44).
    x3 = jax.random.normal(k5, (2, C, 20, 15), dtype=jnp.float32)
    out3 = jax.block_until_ready(
        channel_attention(x3, w1, b1, w2, b2, block_bytes=16 * 1024))
    assert jnp.allclose(out3, _reference(x3, w1, b1, w2, b2),
                        atol=2e-5, rtol=2e-5), "tiled path mismatch"

    # 4) MXU squeeze/excite path (C >= 128).
    Cb, Cb_sq = 128, 8
    xb = jax.random.normal(kx, (4, Cb, 8, 8), dtype=jnp.float32)
    w1b = jax.random.normal(k1, (Cb_sq, Cb, 1, 1), dtype=jnp.float32) * 0.1
    b1b = jax.random.normal(k2, (Cb_sq,), dtype=jnp.float32) * 0.1
    w2b = jax.random.normal(k3, (Cb, Cb_sq, 1, 1), dtype=jnp.float32) * 0.1
    b2b = jax.random.normal(k4, (Cb,), dtype=jnp.float32) * 0.1
    out4 = jax.block_until_ready(channel_attention(xb, w1b, b1b, w2b, b2b))
    assert jnp.allclose(out4, _reference(xb, w1b, b1b, w2b, b2b),
                        atol=1e-4, rtol=1e-4), "MXU path mismatch"

    print("KERNEL_OK")
</pallas_src>

<mosaic_0001>
module attributes {stable_mosaic.version = 11 : i64} {
  func.func @_ca_fused_kernel(%arg0: i32, %arg1: memref<1x32x256xf32, #tpu.memory_space<vmem>>, %arg2: memref<2x32xf32, #tpu.memory_space<vmem>>, %arg3: memref<1x2xf32, #tpu.memory_space<vmem>>, %arg4: memref<32x2xf32, #tpu.memory_space<vmem>>, %arg5: memref<1x32xf32, #tpu.memory_space<vmem>>, %arg6: memref<1x32x256xf32, #tpu.memory_space<vmem>>) attributes {dimension_semantics = [#tpu.dimension_semantics<parallel>], iteration_bounds = array<i64: 2>, scalar_prefetch = 0 : i64, scratch_operands = 0 : i64, tpu.core_type = #tpu.core_type<tc>, window_params = [{transform_indices = @transform_0, window_bounds = array<i64: 1, 32, 256>}, {pipeline_mode = #tpu.pipeline_mode<synchronous>, transform_indices = @transform_1, window_bounds = array<i64: 2, 32>}, {pipeline_mode = #tpu.pipeline_mode<synchronous>, transform_indices = @transform_2, window_bounds = array<i64: 1, 2>}, {pipeline_mode = #tpu.pipeline_mode<synchronous>, transform_indices = @transform_3, window_bounds = array<i64: 32, 2>}, {pipeline_mode = #tpu.pipeline_mode<synchronous>, transform_indices = @transform_4, window_bounds = array<i64: 1, 32>}, {transform_indices = @transform_5, window_bounds = array<i64: 1, 32, 256>}]} {
    %c0 = arith.constant 0 : index
    %c0_0 = arith.constant 0 : index
    %c0_1 = arith.constant 0 : index
    %0 = vector.load %arg1[%c0, %c0_0, %c0_1] : memref<1x32x256xf32, #tpu.memory_space<vmem>>, vector<1x32x256xf32>
    %cst = arith.constant dense<0.000000e+00> : vector<1x32xf32>
    %1 = vector.multi_reduction <add>, %0, %cst [2] : vector<1x32x256xf32> to vector<1x32xf32>
    %cst_2 = arith.constant 3.906250e-03 : f32
    %2 = vector.broadcast %cst_2 : f32 to vector<1x32xf32>
    %3 = arith.mulf %1, %2 : vector<1x32xf32>
    %c0_3 = arith.constant 0 : index
    %c0_4 = arith.constant 0 : index
    %4 = vector.load %arg2[%c0_3, %c0_4] : memref<2x32xf32, #tpu.memory_space<vmem>>, vector<2x32xf32>
    %c0_5 = arith.constant 0 : index
    %c0_6 = arith.constant 0 : index
    %5 = vector.load %arg3[%c0_5, %c0_6] : memref<1x2xf32, #tpu.memory_space<vmem>>, vector<1x2xf32>
    %c0_7 = arith.constant 0 : index
    %c0_8 = arith.constant 0 : index
    %6 = vector.load %arg4[%c0_7, %c0_8] : memref<32x2xf32, #tpu.memory_space<vmem>>, vector<32x2xf32>
    %c0_9 = arith.constant 0 : index
    %c0_10 = arith.constant 0 : index
    %7 = vector.load %arg5[%c0_9, %c0_10] : memref<1x32xf32, #tpu.memory_space<vmem>>, vector<1x32xf32>
    %8 = vector.shape_cast %3 : vector<1x32xf32> to vector<1x1x32xf32>
    %9 = vector.shape_cast %4 : vector<2x32xf32> to vector<1x2x32xf32>
    %10 = vector.broadcast %8 : vector<1x1x32xf32> to vector<1x2x32xf32>
    %11 = arith.mulf %10, %9 : vector<1x2x32xf32>
    %cst_11 = arith.constant dense<0.000000e+00> : vector<1x2xf32>
    %12 = vector.multi_reduction <add>, %11, %cst_11 [2] : vector<1x2x32xf32> to vector<1x2xf32>
    %13 = arith.addf %12, %5 : vector<1x2xf32>
    %cst_12 = arith.constant 0.000000e+00 : f32
    %14 = vector.broadcast %cst_12 : f32 to vector<1x2xf32>
    %15 = arith.maximumf %13, %14 : vector<1x2xf32>
    %16 = vector.shape_cast %15 : vector<1x2xf32> to vector<1x1x2xf32>
    %17 = vector.shape_cast %6 : vector<32x2xf32> to vector<1x32x2xf32>
    %18 = vector.broadcast %16 : vector<1x1x2xf32> to vector<1x32x2xf32>
    %19 = arith.mulf %18, %17 : vector<1x32x2xf32>
    %cst_13 = arith.constant dense<0.000000e+00> : vector<1x32xf32>
    %20 = vector.multi_reduction <add>, %19, %cst_13 [2] : vector<1x32x2xf32> to vector<1x32xf32>
    %21 = arith.addf %20, %7 : vector<1x32xf32>
    %22 = arith.negf %21 : vector<1x32xf32>
    %23 = math.exp %22 : vector<1x32xf32>
    %cst_14 = arith.constant 1.000000e+00 : f32
    %24 = vector.broadcast %cst_14 : f32 to vector<1x32xf32>
    %25 = arith.addf %24, %23 : vector<1x32xf32>
    %26 = arith.divf %24, %25 : vector<1x32xf32>
    %c0_15 = arith.constant 0 : index
    %c0_16 = arith.constant 0 : index
    %c0_17 = arith.constant 0 : index
    %27 = vector.load %arg1[%c0_15, %c0_16, %c0_17] : memref<1x32x256xf32, #tpu.memory_space<vmem>>, vector<1x32x256xf32>
    %28 = vector.shape_cast %26 : vector<1x32xf32> to vector<1x32x1xf32>
    %29 = vector.broadcast %28 : vector<1x32x1xf32> to vector<1x32x256xf32>
    %30 = arith.mulf %27, %29 : vector<1x32x256xf32>
    %c0_18 = arith.constant 0 : index
    %c0_19 = arith.constant 0 : index
    %c0_20 = arith.constant 0 : index
    %31 = vector.load %arg6[%c0_18, %c0_19, %c0_20] : memref<1x32x256xf32, #tpu.memory_space<vmem>>, vector<1x32x256xf32>
    tpu.vector_store %arg6[%c0_18, %c0_19, %c0_20], %30 {strides = array<i32>} : memref<1x32x256xf32, #tpu.memory_space<vmem>>, vector<1x32x256xf32>,
    return
  }
  func.func @transform_0(%arg0: i32) -> (i32, i32, i32) {
    %c0_i32 = arith.constant 0 : i32
    %c0_i32_0 = arith.constant 0 : i32
    %c0_i32_1 = arith.constant 0 : i32
    return %arg0, %c0_i32, %c0_i32_0 : i32, i32, i32
  }
  func.func @transform_1(%arg0: i32) -> (i32, i32) {
    %c0_i32 = arith.constant 0 : i32
    %c0_i32_0 = arith.constant 0 : i32
    %c0_i32_1 = arith.constant 0 : i32
    return %c0_i32, %c0_i32_0 : i32, i32
  }
  func.func @transform_2(%arg0: i32) -> (i32, i32) {
    %c0_i32 = arith.constant 0 : i32
    %c0_i32_0 = arith.constant 0 : i32
    %c0_i32_1 = arith.constant 0 : i32
    return %c0_i32, %c0_i32_0 : i32, i32
  }
  func.func @transform_3(%arg0: i32) -> (i32, i32) {
    %c0_i32 = arith.constant 0 : i32
    %c0_i32_0 = arith.constant 0 : i32
    %c0_i32_1 = arith.constant 0 : i32
    return %c0_i32, %c0_i32_0 : i32, i32
  }
  func.func @transform_4(%arg0: i32) -> (i32, i32) {
    %c0_i32 = arith.constant 0 : i32
    %c0_i32_0 = arith.constant 0 : i32
    %c0_i32_1 = arith.constant 0 : i32
    return %c0_i32, %c0_i32_0 : i32, i32
  }
  func.func @transform_5(%arg0: i32) -> (i32, i32, i32) {
    %c0_i32 = arith.constant 0 : i32
    %c0_i32_0 = arith.constant 0 : i32
    %c0_i32_1 = arith.constant 0 : i32
    return %arg0, %c0_i32, %c0_i32_0 : i32, i32, i32
  }
}

</mosaic_0001>

<bundles_post_ra>
// kernel: tpu_custom_call.1
= control target key start
LH: loop header
LB: loop body
LE: loop exit
PB: predicated region body
PF: predicated region fallthrough
CT: control target
= control target key end

     0   :  { %10 = vsyncpa [#allocation3], 0  ;;  %s1828_s0 = inlined_call_operand.hbm [shape: f32[2,32,256], index: 0, kind: input, shape index: {}]   ;;  %s1829_s1 = inlined_call_operand.vmem [shape: f32[2,32], index: 1, kind: input, shape index: {}]   ;;  %s1830_s2 = inlined_call_operand.vmem [shape: f32[1,2], index: 2, kind: input, shape index: {}]   ;;  %s1831_s3 = inlined_call_operand.vmem [shape: f32[32,2], index: 3, kind: input, shape index: {}]   ;;  %s1832_s4 = inlined_call_operand.vmem [shape: f32[1,32], index: 4, kind: input, shape index: {}]   ;;  %s1833_s5 = inlined_call_operand.hbm [shape: f32[2,32,256], index: 5, kind: output, shape index: {}]  }
   0x1   :  { %12 = vsyncpa [#allocation3 + $0x1], 0 }
   0x2   :  { %13 = vsyncpa [#allocation4], 0 }
   0x3   :  { %15 = vsyncpa [#allocation4 + $0x1], 0  ;;  %s1399_s18 = smov 0   ;;  %s1401_s19 = smov 0  }
   0x4   :  { %s1403_s20 = smov 0   ;;  %s1405_s21 = smov 0  }
   0x5 LB: > { %s1420_s22 = sadd.s32 4294967295, %s1362_s21   ;;  %s1153_s23 = sadd.s32 4294967294, %s1362_s21   ;;  %s1362_s21 = sphi %s1405_s21, %s1843_s21   ;;  %s1358_s20 = sphi %s1403_s20, %s1842_s20   ;;  %s1354_s19 = sphi %s1401_s19, %s1841_s19   ;;  %s1350_s18 = sphi %s1399_s18, %s1840_s18  }
   0x6   : > { %s1424_s24 = sadd.s32 1, %s1362_s21   ;;  %s28_s25 = sadd.s32 1, %s1358_s20 }
   0x7   : > { %s25_s26 = ssub.s32 %s1362_s21, %s1424_s24  ;;  %p35_p0 = scmp.ne.s32.totalorder %s1358_s20, %s1354_s19 }
   0x8   : > { %p26_p1 = scmp.eq.s32.totalorder %s25_s26, 0  ;;  %p36_p2 = scmp.eq.s32.totalorder %s1362_s21, 0 }
   0x9   : > { %p41_p3 = scmp.ne.s32.totalorder %s1354_s19, %s1350_s18  ;;  %p42_p4 = scmp.eq.s32.totalorder %s1420_s22, 0 }
   0xa   : > { %s1436_s27 = scalar_select %p26_p1, %s1358_s20, %s28_s25  }
   0xb   : > { %p1438_p5 = por %p36_p2, %p35_p0  ;;  %p1442_p6 = por %p42_p4, %p41_p3 }
   0xc   : > { %p149_p7 = scmp.eq.s32.totalorder %s1420_s22, 1  ;;  %p155_p8 = scmp.eq.s32.totalorder %s1153_s23, 1 }
   0xd   : > { %p1185_p10 = scmp.lt.s32.totalorder %s1362_s21, 2  ;;  %s187_s7 = sand.u32 1, %s1358_s20  }
   0xe   : > { %p1449_p11 = por %p149_p7, %p35_p0  ;;  %p1453_p12 = por %p155_p8, %p41_p3 }
   0xf   : > { %s1171_s8 = sshll.u32 %s1362_s21, 6  ;;  %s1156_s9 = sshll.u32 %s187_s7, 6 }
  0x10   : > { %s196_s12 = scalar_lea.hbm %s1828_s0, %s1171_s8  ;;  %s191_s14 = scalar_lea.vmem [#allocation2], %s1156_s9 }
  0x11   : > { %s197_s13 = sshll.u32 %s196_s12, 4  ;;  %s199_s15 = sshll.u32 %s191_s14, 4  ;;  %s198_s13 = int_to_ptr.hbm [resolvable:$true] %s197_s13  ;;  %s200_s15 = int_to_ptr.vmem [resolvable:$true] %s199_s15 }
  0x12   : > { %p1464_p13 = pnand %p1185_p10, %p1438_p5  ;;  %p1159_p0 = scmp.ge.s32.totalorder %s1362_s21, 1 }
  0x13   : > { %p207_p1 = scmp.lt.s32.totalorder %s1362_s21, 3  ;;  %s188_s17 = scalar_lea.sflag [#allocation3], %s187_s7 }
  0x14   : > { %s1266_s23 = sshra.s32 %s198_s13, 4  ;;  %p1270_p3 = pneg %p1464_p13  ;;  %s1267_s23 = int_to_ptr.hbm [resolvable:$true] %s1266_s23 }
  0x15   : > { %s1268_s25 = scalar_lea.hbm %s1267_s23, 64  ;;  %s1273_s28 = scalar_lea.hbm %s1828_s0, 128 }
  0x16   : > { %p1269_p2 = scmp.ne.s32.totalorder %s1267_s23, %s1268_s25  ;;  %p1274_p5 = scmp.lt.s32.totalorder %s1267_s23, %s1828_s0 }
  0x17   : > { %p1275_p8 = scmp.lt.s32.totalorder %s1273_s28, %s1268_s25 }
  0x18   : > { %p1271_p4 = pnand %p1270_p3, %p1269_p2 }
  0x19   : > { %p1276_p10 = por %p1275_p8, %p1274_p5 }
  0x1a   : > { %p1272_p7 = pneg %p1271_p4 }
  0x1c   : > { %p1277_p9 = pnand %p1276_p10, %p1272_p7 }
  0x1e   : > { %1280 = shalt.err (!%p1277_p9)
}
  0x1f   : > { %s1364_s7 = smov 256   ;;  %s1365_s11 = smov 16  }
  0x20   : > { %1180 = dma.hbm_to_vmem [thread:$0]  (!%p1464_p13), %s198_s13, 1024, %s200_s15, %s188_s17, %s1364_s7, %s1364_s7, %s1365_s11  }
  0x21   : > { %p208_p2 = pnand %p1159_p0, %p207_p1 }
  0x22   : > { %s1485_s12 = sand.u32 (!%p208_p2), 1, %s1354_s19  }
  0x23   : > { %211 = sbr.rel (%p208_p2) target bundleno = 954 (0x3ba), region = 40  ;;  %s1160_s14 = sshll.u32 (!%p208_p2), %s1485_s12, 6 }
  0x24   : > { %s214_s23 = scalar_lea.sflag (!%p208_p2), [#allocation3], %s1485_s12  ;;  %s217_s25 = scalar_lea.vmem (!%p208_p2), [#allocation2], %s1160_s14 }
  0x28   : > { %1341 = dma.done.wait (%p1442_p6), %s214_s23, 1024  }
  0x29   : > { %1343 = vsyncadd (%p1442_p6), %s214_s23, 4294966272  ;;  %v278_v0 = vlaneseq  ;;  %v1507_v4 = vld [vmem:[%s217_s25 + $0x20] sm:$0xff]  ;;  %v1509_v5 = vld [vmem:[%s217_s25 + $0x28] sm:$0xff]  ;;  %v1366_v40 = vmov 0   ;;  %vm380_vm0 = vcmask 130112   ;;  %vm384_vm1 = vcmask 195712  }
  0x2a   : > { %v1511_v6 = vld [vmem:[%s217_s25] sm:$0xff]  ;;  %v259_v7 = vadd.f32 %v1509_v5, %v1507_v4  ;;  %v1515_v8 = vld [vmem:[%s217_s25 + $0x8] sm:$0xff]  ;;  %v1522_v12 = vld [vmem:[%s217_s25 + $0x30] sm:$0xff]  ;;  %vm388_vm2 = vcmask 261312   ;;  %vm397_vm3 = vcmask 1041409   ;;  %vm400_vm4 = vcmask 254976  }
  0x2b   : > { %v1496_v1 = vshrl.u32 %v278_v0, 7  ;;  %v269_v9 = vld [vmem:[%s1829_s1] sm:$0x3]  ;;  %v253_v10 = vadd.f32 %v1515_v8, %v1511_v6  ;;  %v1524_v13 = vld [vmem:[%s217_s25 + $0x38] sm:$0xff]  ;;  %v1526_v14 = vld [vmem:[%s217_s25 + $0x10] sm:$0xff]  ;;  %vm868_vm5 = vcmask 1042434  }
  0x2c   : > { %v277_v11 = vperm.slane %v269_v9, 0  ;;  %260 = vadd.xlane.f32.xlu1 %v259_v7  ;;  %v1528_v15 = vld [vmem:[%s217_s25 + $0x18] sm:$0xff]  ;;  %v262_v16 = vadd.f32 %v1524_v13, %v1522_v12  ;;  %v302_v19 = vperm.slane %v269_v9, 1  ;;  %v271_v20 = vld [vmem:[%s1831_s3] sm:$0xff]  ;;  %v1549_v24 = vld [vmem:[%s1831_s3 + $0x8] sm:$0xff]  ;;  %vm870_vm6 = vcmask 1043459  }
  0x2d   : > { %1224 = vset.pattern.permute.xlu2 %v1496_v1  ;;  %v1500_v2 = vadd.s32 16, %v1496_v1  ;;  %v1503_v3 = vadd.s32 24, %v1496_v1  ;;  %254 = vadd.xlane.f32.xlu0 %v253_v10  ;;  %v256_v17 = vadd.f32 %v1528_v15, %v1526_v14  ;;  %v1535_v18 = vadd.s32 8, %v1496_v1  ;;  %v1556_v27 = vld [vmem:[%s1831_s3 + $0x10] sm:$0xff]  ;;  %v1563_v30 = vld [vmem:[%s1831_s3 + $0x18] sm:$0xff]  ;;  %s244_s29 = scalar_lea.vmem [#allocation5], %s1160_s14 }
  0x2e   : > { %v419_v21 = vperm.slane %v271_v20, 0  ;;  %v433_v22 = vperm.slane %v271_v20, 2  ;;  %v447_v23 = vperm.slane %v271_v20, 4  ;;  %v496_v25 = vperm.slane %v1549_v24, 3  ;;  %v1248_v35 = vld [vmem:[%s1830_s2] ss:$0 sm:$0xff] }
  0x2f   : > { %1226 = vset.pattern.permute.xlu0 %v1500_v2  ;;  %1227 = vset.pattern.permute.xlu1 %v1503_v3  ;;  %v461_v26 = vperm.slane %v271_v20, 6  ;;  %v475_v28 = vperm.slane %v1549_v24, 0  ;;  %v573_v29 = vperm.slane %v1556_v27, 6  ;;  %v489_v31 = vperm.slane %v1549_v24, 2  ;;  %s1172_s13 = sshll.u32 %s1420_s22, 6  ;;  %s1077_s17 = sshll.u32 %s244_s29, 4  ;;  %s1078_s17 = int_to_ptr.vmem [resolvable:$true] %s1077_s17 }
  0x30   : > { %v594_v32 = vperm.slane %v1563_v30, 1  ;;  %v510_v33 = vperm.slane %v1549_v24, 5  ;;  %v615_v34 = vperm.slane %v1563_v30, 4  ;;  %v636_v36 = vperm.slane %v1563_v30, 7  ;;  %s1076_s16 = scalar_lea.hbm %s1833_s5, %s1172_s13  ;;  %s1065_s8 = scalar_lea.sflag [#allocation4], %s1485_s12 }
  0x31   : > { %v524_v37 = vperm.slane %v1549_v24, 7  ;;  %v426_v38 = vperm.slane %v271_v20, 1  ;;  %v440_v39 = vperm.slane %v271_v20, 3  ;;  %v454_v44 = vperm.slane %v271_v20, 5  ;;  %s1079_s26 = sshll.u32 %s1076_s16, 4  ;;  %s1316_s7 = scalar_lea.hbm %s1833_s5, 128  ;;  %s1080_s26 = int_to_ptr.hbm [resolvable:$true] %s1079_s26 }
  0x32   : > { %v468_v46 = vperm.slane %v271_v20, 7  ;;  %v482_v49 = vperm.slane %v1549_v24, 1  ;;  %v503_v54 = vperm.slane %v1549_v24, 4  ;;  %v517_v62 = vperm.slane %v1549_v24, 6  ;;  %s1310_s28 = sshra.s32 %s1080_s26, 4  ;;  %s1311_s28 = int_to_ptr.hbm [resolvable:$true] %s1310_s28 }
  0x33   : > { %vm872_vm7 = vcmask 1044484   ;;  %vm874_vm8 = vcmask 1045509   ;;  %vm876_vm9 = vcmask 1046534   ;;  %vm878_vm10 = vcmask 1047559   ;;  %s1312_s22 = scalar_lea.hbm %s1311_s28, 64  ;;  %p1317_p0 = scmp.lt.s32.totalorder %s1311_s28, %s1833_s5 }
  0x34   : > { %263 = vadd.xlane.f32.xlu1 %v262_v16  ;;  %vm905_vm11 = vcmask 15360   ;;  %p1313_p6 = scmp.ne.s32.totalorder %s1311_s28, %s1312_s22  ;;  %p1318_p1 = scmp.lt.s32.totalorder %s1316_s7, %s1312_s22 }
  0x35   : > { %282 = vperm.xlu2 %1224, %v277_v11   ;;  %257 = vadd.xlane.f32.xlu0 %v256_v17 }
  0x36   : > { %p1314_p9 = pnand %p1313_p6, %p1449_p11  ;;  %p1319_p3 = por %p1318_p1, %p1317_p0 }
  0x38   : > { %p1315_p13 = pneg %p1314_p9 }
  0x3a   : > { %p1320_p4 = pnand %p1319_p3, %p1315_p13 }
  0x3d   : > { %1225 = vset.pattern.permute.xlu2 %v1535_v18 }
  0x45   : > { %288 = vperm.xlu2 %1225, %v277_v11  }
  0x49   : > { %294 = vperm.xlu0 %1226, %v277_v11  }
  0x4d   : > { %1228 = vset.pattern.permute.xlu2 %v1496_v1  ;;  %300 = vperm.xlu1 %1227, %v277_v11  }
  0x51   : > { %1234 = vset.pattern.permute.xlu0 %v1496_v1 }
  0x55   : > { %307 = vperm.xlu2 %1228, %v302_v19   ;;  %1233 = vset.pattern.permute.xlu1 %v1496_v1 }
  0x59   : > { %501 = vperm.xlu0 %1234, %v496_v25  }
  0x5d   : > { %1229 = vset.pattern.permute.xlu2 %v1535_v18  ;;  %424 = vperm.xlu1 %1233, %v419_v21  }
  0x61   : > { %578 = vperm.xlu0 %1234, %v573_v29  }
  0x65   : > { %313 = vperm.xlu2 %1229, %v302_v19   ;;  %438 = vperm.xlu1 %1233, %v433_v22  }
  0x69   : > { %599 = vperm.xlu0 %1234, %v594_v32  }
  0x6d   : > { %1230 = vset.pattern.permute.xlu2 %v1500_v2  ;;  %452 = vperm.xlu1 %1233, %v447_v23  }
  0x71   : > { %620 = vperm.xlu0 %1234, %v615_v34  }
  0x75   : > { %319 = vperm.xlu2 %1230, %v302_v19   ;;  %466 = vperm.xlu1 %1233, %v461_v26  }
  0x79   : > { %641 = vperm.xlu0 %1234, %v636_v36   ;;  %v566_v36 = vperm.slane %v1556_v27, 5 }
  0x7d   : > { %1231 = vset.pattern.permute.xlu2 %v1503_v3  ;;  %480 = vperm.xlu1 %1233, %v475_v28  }
  0x81   : > { %1239 = vset.pattern.permute.xlu0 %v1366_v40 }
  0x85   : > { %325 = vperm.xlu2 %1231, %v302_v19   ;;  %494 = vperm.xlu1 %1233, %v489_v31  }
  0x8d   : > { %1232 = vset.pattern.permute.xlu2 %v1496_v1  ;;  %515 = vperm.xlu1 %1233, %v510_v33   ;;  %v552_v33 = vperm.slane %v1556_v27, 3 }
  0x8f   : > { %v283_v43 = vpop.permute.xlu2 %282 }
  0x95   : > { %410 = vperm.xlu2 %1232, %v1248_v35   ;;  %529 = vperm.xlu1 %1233, %v524_v37   ;;  %v531_v35 = vperm.slane %v1556_v27, 0 }
  0x9d   : > { %431 = vperm.xlu2 %1232, %v426_v38   ;;  %1235 = vset.pattern.permute.xlu1 %v1366_v40 }
  0x9f   : > { %v261_v47 = vpop.xlane.xlu1 %260  ;;  %v289_v48 = vpop.permute.xlu2 %288 }
  0xa0   : > { %v255_v41 = vpop.xlane.xlu0 %254  ;;  %v267_v52 = vmul.f32 0.00390625, %v261_v47 }
  0xa1   : > { %v265_v42 = vmul.f32 0.00390625, %v255_v41  ;;  %v587_v41 = vperm.slane %v1563_v30, 0 }
  0xa3   : > { %v335_v45 = vmul.f32 %v283_v43, %v265_v42 }
  0xa5   : > { %445 = vperm.xlu2 %1232, %v440_v39   ;;  %352 = vperm.xlu1 %1235, %v335_v45   ;;  %v545_v45 = vperm.slane %v1556_v27, 2 }
  0xa7   : > { %v264_v51 = vpop.xlane.xlu1 %263 }
  0xa8   : > { %v258_v50 = vpop.xlane.xlu0 %257  ;;  %v268_v56 = vmul.f32 0.00390625, %v264_v51 }
  0xa9   : > { %v266_v61 = vmul.f32 0.00390625, %v258_v50  ;;  %v629_v50 = vperm.slane %v1563_v30, 6 }
  0xab   : > { %v336_v10 = vmul.f32 %v289_v48, %v266_v61 }
  0xad   : > { %459 = vperm.xlu2 %1232, %v454_v44  }
  0xaf   : > { %v308_v53 = vpop.permute.xlu2 %307 }
  0xb0   : > { %v339_v7 = vmul.f32 %v308_v53, %v265_v42  ;;  %v580_v53 = vperm.slane %v1556_v27, 7 }
  0xb5   : > { %473 = vperm.xlu2 %1232, %v468_v46   ;;  %v608_v46 = vperm.slane %v1563_v30, 3 }
  0xbb   : > { %v295_v55 = vpop.permute.xlu0 %294 }
  0xbc   : > { %v337_v57 = vmul.f32 %v295_v55, %v267_v52 }
  0xbd   : > { %487 = vperm.xlu2 %1232, %v482_v49   ;;  %v559_v49 = vperm.slane %v1556_v27, 4 }
  0xbe   : > { %358 = vperm.xlu1 %1235, %v337_v57  }
  0xbf   : > { %v301_v58 = vpop.permute.xlu1 %300  ;;  %v314_v60 = vpop.permute.xlu2 %313 }
  0xc0   : > { %v338_v59 = vmul.f32 %v301_v58, %v268_v56  ;;  %v340_v63 = vmul.f32 %v314_v60, %v266_v61 }
  0xc2   : > { %361 = vperm.xlu0 %1239, %v338_v59   ;;  %v601_v59 = vperm.slane %v1563_v30, 2 }
  0xc5   : > { %508 = vperm.xlu2 %1232, %v503_v54   ;;  %v1636_v54 = vld [vmem:[%s1832_s4] ss:$0 sm:$0xff] }
  0xc6   : > { %367 = vperm.xlu1 %1235, %v340_v63  }
  0xcb   : > { %v1609_v34 = vpop.permute.xlu0 %501 }
  0xcd   : > { %522 = vperm.xlu2 %1232, %v517_v62  }
  0xcf   : > { %v320_v9 = vpop.permute.xlu2 %319  ;;  %v1582_v19 = vpop.permute.xlu1 %424 }
  0xd0   : > { %v341_v17 = vmul.f32 %v320_v9, %v267_v52 }
  0xd3   : > { %v1617_v39 = vpop.permute.xlu0 %578 }
  0xd5   : > { %1236 = vset.pattern.permute.xlu2 %v1366_v40 }
  0xd6   : > { %364 = vperm.xlu2 %1236, %v339_v7  }
  0xd7   : > { %v1587_v21 = vpop.permute.xlu1 %438 }
  0xdb   : > { %v1624_v44 = vpop.permute.xlu0 %599 }
  0xde   : > { %355 = vperm.xlu2 %1236, %v336_v10  }
  0xdf   : > { %v326_v11 = vpop.permute.xlu2 %325  ;;  %v1593_v24 = vpop.permute.xlu1 %452 }
  0xe0   : > { %v342_v16 = vmul.f32 %v326_v11, %v268_v56  ;;  %v1639_v56 = vand.u32 127, %v278_v0 }
  0xe2   : > { %373 = vperm.xlu1 %1235, %v342_v16   ;;  %v378_v58 = vadd.s32 4294967288, %v1639_v56  ;;  %v382_v61 = vadd.s32 4294967280, %v1639_v56  ;;  %v386_v63 = vadd.s32 4294967272, %v1639_v56 }
  0xe3   : > { %v1630_v51 = vpop.permute.xlu0 %620 }
  0xe6   : > { %370 = vperm.xlu2 %1236, %v341_v17  }
  0xe7   : > { %v1597_v26 = vpop.permute.xlu1 %466 }
  0xea   : > { %1238 = vset.pattern.permute.xlu1 %v1496_v1 }
  0xeb   : > { %v1641_v57 = vpop.permute.xlu0 %641 }
  0xee   : > { %1237 = vset.pattern.permute.xlu2 %v1496_v1  ;;  %v538_v1 = vperm.slane %v1556_v27, 1 }
  0xef   : > { %v1585_v20 = vpop.permute.xlu2 %410  ;;  %v1601_v29 = vpop.permute.xlu1 %480 }
  0xf2   : > { %543 = vperm.xlu1 %1238, %v538_v1  }
  0xf6   : > { %536 = vperm.xlu2 %1237, %v531_v35   ;;  %v622_v35 = vperm.slane %v1563_v30, 5 }
  0xf7   : > { %v1589_v22 = vpop.permute.xlu2 %431  ;;  %v1606_v32 = vpop.permute.xlu1 %494 }
  0xfa   : > { %557 = vperm.xlu1 %1238, %v552_v33  }
  0xfe   : > { %550 = vperm.xlu2 %1237, %v545_v45  }
  0xff   : > { %v1591_v23 = vpop.permute.xlu2 %445  ;;  %v1615_v38 = vpop.permute.xlu1 %515 }
 0x102   : > { %571 = vperm.xlu1 %1238, %v566_v36  }
 0x106   : > { %564 = vperm.xlu2 %1237, %v559_v49  }
 0x107   : > { %v1595_v25 = vpop.permute.xlu2 %459  ;;  %v1622_v43 = vpop.permute.xlu1 %529 }
 0x10a   : > { %592 = vperm.xlu1 %1238, %v587_v41  }
 0x10e   : > { %585 = vperm.xlu2 %1237, %v580_v53  }
 0x10f   : > { %v1599_v28 = vpop.permute.xlu2 %473 }
 0x112   : > { %613 = vperm.xlu1 %1238, %v608_v46  }
 0x116   : > { %606 = vperm.xlu2 %1237, %v601_v59  }
 0x117   : > { %v1604_v31 = vpop.permute.xlu2 %487  ;;  %v353_v47 = vpop.permute.xlu1 %352 }
 0x118   : > { %v377_v62 = vperm.slane %v353_v47, %v1639_v56 }
 0x11a   : > { %634 = vperm.xlu1 %1238, %v629_v50  }
 0x11e   : > { %627 = vperm.xlu2 %1237, %v622_v35  }
 0x11f   : > { %v1613_v37 = vpop.permute.xlu2 %508 }
 0x122   : > { %924 = vperm.xlu1 %1238, %v1636_v54  }
 0x126   : > { %1240 = vset.pattern.permute.xlu2 %v1366_v40 }
 0x127   : > { %v1620_v42 = vpop.permute.xlu2 %522 }
 0x12a   : > { %1241 = vset.pattern.permute.xlu1 %v1366_v40 }
 0x130   : > { %v365_v48 = vpop.permute.xlu2 %364  ;;  %v359_v52 = vpop.permute.xlu1 %358 }
 0x131   : > { %v390_v10 = vperm.slane %v365_v48, %v1639_v56  ;;  %v383_v16 = vperm.slane %v359_v52, %v382_v61 }
 0x134   : > { %v362_v9 = vpop.permute.xlu0 %361 }
 0x135   : > { %v387_v1 = vperm.slane %v362_v9, %v386_v63 }
 0x138   : > { %v356_v55 = vpop.permute.xlu2 %355  ;;  %v368_v60 = vpop.permute.xlu1 %367 }
 0x139   : > { %v379_v27 = vperm.slane %v356_v55, %v378_v58  ;;  %v391_v0 = vperm.slane %v368_v60, %v378_v58 }
 0x13b   : > { %v381_v11 = vsel %vm380_vm0, %v379_v27, %v377_v62  ;;  %v392_v33 = vsel %vm380_vm0, %v391_v0, %v390_v10 }
 0x13c   : > { %v385_v41 = vsel %vm384_vm1, %v383_v16, %v381_v11 }
 0x13d   : > { %v389_v47 = vsel %vm388_vm2, %v387_v1, %v385_v41 }
 0x140   : > { %v371_v7 = vpop.permute.xlu2 %370 }
 0x141   : > { %v393_v17 = vperm.slane %v371_v7, %v382_v61 }
 0x143   : > { %v394_v46 = vsel %vm384_vm1, %v393_v17, %v392_v33 }
 0x154   : > { %v374_v36 = vpop.permute.xlu1 %373 }
 0x155   : > { %v395_v45 = vperm.slane %v374_v36, %v386_v63 }
 0x157   : > { %v396_v49 = vsel %vm388_vm2, %v395_v45, %v394_v46 }
 0x158   : > { %v398_v48 = vsel %vm397_vm3, %v396_v49, %v389_v47 }
 0x159   : > { %v401_v50 = vsel %vm400_vm4, %v398_v48, 0.0 }
 0x15a   : > { %402 = vadd.xlane.f32.xlu0 %v401_v50 }
 0x164   : > { %v544_v27 = vpop.permute.xlu1 %543 }
 0x16c   : > { %v558_v62 = vpop.permute.xlu1 %557 }
 0x1cd   : > { %v403_v52 = vpop.xlane.xlu0 %402 }
 0x1ce   : > { %v413_v53 = vadd.f32 %v1585_v20, %v403_v52 }
 0x1d0   : > { %v1655_v30 = vmax.f32 %v413_v53, 0.0 }
 0x1d2   : > { %v675_v55 = vmul.f32 %v1582_v19, %v1655_v30  ;;  %v676_v58 = vmul.f32 %v1589_v22, %v1655_v30  ;;  %v677_v59 = vmul.f32 %v1587_v21, %v1655_v30  ;;  %v682_v60 = vmul.f32 %v1599_v28, %v1655_v30  ;;  %v537_v19 = vpop.permute.xlu2 %536 }
 0x1d3   : > { %v679_v20 = vmul.f32 %v1593_v24, %v1655_v30  ;;  %v678_v61 = vmul.f32 %v1591_v23, %v1655_v30  ;;  %v685_v21 = vmul.f32 %v1606_v32, %v1655_v30  ;;  %v681_v22 = vmul.f32 %v1597_v26, %v1655_v30  ;;  %v572_v26 = vpop.permute.xlu1 %571 }
 0x1d4   : > { %746 = vperm.xlu0 %1239, %v677_v59   ;;  %743 = vperm.xlu1 %1241, %v676_v58   ;;  %v680_v28 = vmul.f32 %v1595_v25, %v1655_v30  ;;  %v688_v23 = vmul.f32 %v1615_v38, %v1655_v30  ;;  %v684_v24 = vmul.f32 %v1604_v31, %v1655_v30 }
 0x1d5   : > { %740 = vperm.xlu2 %1240, %v675_v55   ;;  %v683_v32 = vmul.f32 %v1601_v29, %v1655_v30  ;;  %v691_v25 = vmul.f32 %v537_v19, %v1655_v30  ;;  %v687_v0 = vmul.f32 %v1613_v37, %v1655_v30  ;;  %v686_v7 = vmul.f32 %v1609_v34, %v1655_v30 }
 0x1d6   : > { %v690_v29 = vmul.f32 %v1622_v43, %v1655_v30  ;;  %v689_v10 = vmul.f32 %v1620_v42, %v1655_v30  ;;  %v694_v11 = vmul.f32 %v558_v62, %v1655_v30  ;;  %v692_v16 = vmul.f32 %v544_v27, %v1655_v30 }
 0x1d7   : > { %v703_v43 = vmul.f32 %v1630_v51, %v1655_v30  ;;  %v700_v42 = vmul.f32 %v1624_v44, %v1655_v30  ;;  %v697_v33 = vmul.f32 %v1617_v39, %v1655_v30  ;;  %v706_v45 = vmul.f32 %v1641_v57, %v1655_v30 }
 0x1d8   : > { %v696_v46 = vmul.f32 %v572_v26, %v1655_v30 }
 0x1da   : > { %v551_v63 = vpop.permute.xlu2 %550 }
 0x1db   : > { %v593_v31 = vpop.permute.xlu1 %592  ;;  %v693_v34 = vmul.f32 %v551_v63, %v1655_v30 }
 0x1dc   : > { %761 = vperm.xlu0 %1239, %v682_v60   ;;  %752 = vperm.xlu1 %1241, %v679_v20   ;;  %v699_v9 = vmul.f32 %v593_v31, %v1655_v30 }
 0x1dd   : > { %749 = vperm.xlu2 %1240, %v678_v61  }
 0x1e2   : > { %v565_v38 = vpop.permute.xlu2 %564 }
 0x1e3   : > { %v614_v35 = vpop.permute.xlu1 %613  ;;  %v695_v36 = vmul.f32 %v565_v38, %v1655_v30 }
 0x1e4   : > { %770 = vperm.xlu0 %1239, %v685_v21   ;;  %758 = vperm.xlu1 %1241, %v681_v22   ;;  %v702_v41 = vmul.f32 %v614_v35, %v1655_v30 }
 0x1e5   : > { %755 = vperm.xlu2 %1240, %v680_v28  }
 0x1ea   : > { %v586_v37 = vpop.permute.xlu2 %585 }
 0x1eb   : > { %v635_v39 = vpop.permute.xlu1 %634  ;;  %v698_v47 = vmul.f32 %v586_v37, %v1655_v30 }
 0x1ec   : > { %779 = vperm.xlu0 %1239, %v688_v23   ;;  %767 = vperm.xlu1 %1241, %v684_v24   ;;  %v705_v49 = vmul.f32 %v635_v39, %v1655_v30 }
 0x1ed   : > { %764 = vperm.xlu2 %1240, %v683_v32  }
 0x1f2   : > { %v607_v17 = vpop.permute.xlu2 %606 }
 0x1f3   : > { %v701_v1 = vmul.f32 %v607_v17, %v1655_v30  ;;  %v1712_v50 = vpop.permute.xlu1 %924 }
 0x1f4   : > { %788 = vperm.xlu0 %1239, %v691_v25   ;;  %776 = vperm.xlu1 %1241, %v687_v0  }
 0x1f5   : > { %773 = vperm.xlu2 %1240, %v686_v7  }
 0x1fa   : > { %v628_v51 = vpop.permute.xlu2 %627 }
 0x1fb   : > { %v704_v44 = vmul.f32 %v628_v51, %v1655_v30 }
 0x1fc   : > { %812 = vperm.xlu0 %1239, %v699_v9   ;;  %785 = vperm.xlu1 %1241, %v690_v29  }
 0x1fd   : > { %782 = vperm.xlu2 %1240, %v689_v10  }
 0x204   : > { %797 = vperm.xlu0 %1239, %v694_v11   ;;  %794 = vperm.xlu1 %1241, %v693_v34  }
 0x205   : > { %791 = vperm.xlu2 %1240, %v692_v16  }
 0x20c   : > { %824 = vperm.xlu0 %1239, %v703_v43   ;;  %818 = vperm.xlu1 %1241, %v701_v1  }
 0x20d   : > { %815 = vperm.xlu2 %1240, %v700_v42  }
 0x214   : > { %806 = vperm.xlu0 %1239, %v697_v33   ;;  %800 = vperm.xlu1 %1241, %v695_v36  }
 0x215   : > { %821 = vperm.xlu2 %1240, %v702_v41  }
 0x21c   : > { %833 = vperm.xlu0 %1239, %v706_v45   ;;  %827 = vperm.xlu1 %1241, %v704_v44  }
 0x21d   : > { %803 = vperm.xlu2 %1240, %v696_v46  }
 0x224   : > { %1242 = vset.pattern.permute.xlu0 %v1535_v18  ;;  %809 = vperm.xlu1 %1241, %v698_v47  }
 0x225   : > { %830 = vperm.xlu2 %1240, %v705_v49  }
 0x22c   : > { %1244 = vset.pattern.permute.xlu1 %v1503_v3 }
 0x22d   : > { %1243 = vset.pattern.permute.xlu2 %v1500_v2 }
 0x22f   : > { %v741_v57 = vpop.permute.xlu2 %740 }
 0x230   : > { %v835_v30 = vperm.slane %v741_v57, %v1639_v56 }
 0x237   : > { %v750_v48 = vpop.permute.xlu2 %749 }
 0x238   : > { %v838_v19 = vperm.slane %v750_v48, %v1639_v56 }
 0x23f   : > { %v756_v52 = vpop.permute.xlu2 %755 }
 0x240   : > { %v840_v62 = vperm.slane %v756_v52, %v1639_v56 }
 0x246   : > { %v747_v53 = vpop.permute.xlu0 %746  ;;  %v744_v55 = vpop.permute.xlu1 %743 }
 0x247   : > { %v765_v58 = vpop.permute.xlu2 %764  ;;  %v836_v59 = vperm.slane %v744_v55, %v1639_v56  ;;  %v837_v18 = vperm.slane %v747_v53, %v1639_v56 }
 0x248   : > { %v843_v29 = vperm.slane %v765_v58, %v1639_v56 }
 0x249   : > { %v867_v3 = vsel %vm397_vm3, %v836_v59, %v835_v30 }
 0x24a   : > { %v869_v2 = vsel %vm868_vm5, %v837_v18, %v867_v3 }
 0x24b   : > { %v871_v21 = vsel %vm870_vm6, %v838_v19, %v869_v2 }
 0x24e   : > { %v762_v60 = vpop.permute.xlu0 %761  ;;  %v753_v27 = vpop.permute.xlu1 %752 }
 0x24f   : > { %v839_v20 = vperm.slane %v753_v27, %v1639_v56  ;;  %v774_v61 = vpop.permute.xlu2 %773  ;;  %v842_v63 = vperm.slane %v762_v60, %v1639_v56 }
 0x250   : > { %v846_v43 = vperm.slane %v774_v61, %v1639_v56 }
 0x251   : > { %v873_v22 = vsel %vm872_vm7, %v839_v20, %v871_v21 }
 0x252   : > { %v875_v32 = vsel %vm874_vm8, %v840_v62, %v873_v22 }
 0x256   : > { %v771_v28 = vpop.permute.xlu0 %770  ;;  %v759_v23 = vpop.permute.xlu1 %758 }
 0x257   : > { %v841_v24 = vperm.slane %v759_v23, %v1639_v56  ;;  %v783_v0 = vpop.permute.xlu2 %782  ;;  %v845_v37 = vperm.slane %v771_v28, %v1639_v56 }
 0x258   : > { %v849_v51 = vperm.slane %v783_v0, %v1639_v56 }
 0x259   : > { %v877_v26 = vsel %vm876_vm9, %v841_v24, %v875_v32 }
 0x25a   : > { %v879_v25 = vsel %vm878_vm10, %v842_v63, %v877_v26 }
 0x25b   : > { %v906_v7 = vsel %vm905_vm11, %v879_v25, 0.0 }
 0x25c   : > { %907 = vadd.xlane.f32.xlu2 %v906_v7 }
 0x25e   : > { %v780_v38 = vpop.permute.xlu0 %779  ;;  %v768_v31 = vpop.permute.xlu1 %767 }
 0x25f   : > { %v844_v9 = vperm.slane %v768_v31, %v1639_v56  ;;  %v792_v11 = vpop.permute.xlu2 %791  ;;  %v848_v35 = vperm.slane %v780_v38, %v1639_v56 }
 0x260   : > { %v852_v19 = vperm.slane %v792_v11, %v1639_v56 }
 0x261   : > { %v880_v10 = vsel %vm397_vm3, %v844_v9, %v843_v29 }
 0x262   : > { %v881_v16 = vsel %vm868_vm5, %v845_v37, %v880_v10 }
 0x263   : > { %v882_v42 = vsel %vm870_vm6, %v846_v43, %v881_v16 }
 0x266   : > { %v789_v34 = vpop.permute.xlu0 %788  ;;  %v777_v17 = vpop.permute.xlu1 %776 }
 0x267   : > { %v847_v1 = vperm.slane %v777_v17, %v1639_v56  ;;  %v816_v44 = vpop.permute.xlu2 %815  ;;  %v851_v27 = vperm.slane %v789_v34, %v1639_v56 }
 0x268   : > { %v860_v3 = vperm.slane %v816_v44, %v1639_v56 }
 0x269   : > { %v883_v33 = vsel %vm872_vm7, %v847_v1, %v882_v42  ;;  %v887_v22 = vsel %vm397_vm3, %v852_v19, %v851_v27 }
 0x26a   : > { %v884_v41 = vsel %vm874_vm8, %v848_v35, %v883_v33 }
 0x26b   : > { %v885_v39 = vsel %vm876_vm9, %v849_v51, %v884_v41 }
 0x26e   : > { %v813_v36 = vpop.permute.xlu0 %812  ;;  %v786_v45 = vpop.permute.xlu1 %785 }
 0x26f   : > { %v850_v46 = vperm.slane %v786_v45, %v1639_v56  ;;  %v822_v52 = vpop.permute.xlu2 %821  ;;  %v859_v59 = vperm.slane %v813_v36, %v1639_v56 }
 0x270   : > { %v862_v21 = vperm.slane %v822_v52, %v1639_v56 }
 0x271   : > { %v886_v47 = vsel %vm878_vm10, %v850_v46, %v885_v39  ;;  %v894_v2 = vsel %vm397_vm3, %v860_v3, %v859_v59 }
 0x272   : > { %v909_v49 = vsel %vm905_vm11, %v886_v47, 0.0 }
 0x273   : > { %910 = vadd.xlane.f32.xlu1 %v909_v49 }
 0x276   : > { %v798_v57 = vpop.permute.xlu0 %797  ;;  %v795_v48 = vpop.permute.xlu1 %794 }
 0x277   : > { %v804_v58 = vpop.permute.xlu2 %803  ;;  %v853_v20 = vperm.slane %v795_v48, %v1639_v56  ;;  %v854_v28 = vperm.slane %v798_v57, %v1639_v56 }
 0x278   : > { %v856_v11 = vperm.slane %v804_v58, %v1639_v56 }
 0x279   : > { %v888_v24 = vsel %vm868_vm5, %v853_v20, %v887_v22 }
 0x27a   : > { %v889_v31 = vsel %vm870_vm6, %v854_v28, %v888_v24 }
 0x27e   : > { %v825_v53 = vpop.permute.xlu0 %824  ;;  %v819_v55 = vpop.permute.xlu1 %818 }
 0x27f   : > { %v861_v18 = vperm.slane %v819_v55, %v1639_v56  ;;  %v831_v23 = vpop.permute.xlu2 %830  ;;  %v863_v63 = vperm.slane %v825_v53, %v1639_v56 }
 0x280   : > { %v865_v7 = vperm.slane %v831_v23, %v1639_v56 }
 0x281   : > { %v895_v61 = vsel %vm868_vm5, %v861_v18, %v894_v2 }
 0x282   : > { %v896_v62 = vsel %vm870_vm6, %v862_v21, %v895_v61 }
 0x283   : > { %v897_v38 = vsel %vm872_vm7, %v863_v63, %v896_v62 }
 0x286   : > { %v807_v30 = vpop.permute.xlu0 %806  ;;  %v801_v60 = vpop.permute.xlu1 %800 }
 0x287   : > { %v855_v32 = vperm.slane %v801_v60, %v1639_v56  ;;  %v857_v43 = vperm.slane %v807_v30, %v1639_v56 }
 0x289   : > { %v890_v10 = vsel %vm872_vm7, %v855_v32, %v889_v31 }
 0x28a   : > { %v891_v17 = vsel %vm874_vm8, %v856_v11, %v890_v10 }
 0x28b   : > { %v892_v33 = vsel %vm876_vm9, %v857_v43, %v891_v17 }
 0x28c   : > { %942 = vperm.xlu1 %1244, %v1636_v54  }
 0x28e   : > { %v834_v26 = vpop.permute.xlu0 %833  ;;  %v828_v25 = vpop.permute.xlu1 %827 }
 0x28f   : > { %v864_v0 = vperm.slane %v828_v25, %v1639_v56  ;;  %v866_v9 = vperm.slane %v834_v26, %v1639_v56 }
 0x291   : > { %v898_v29 = vsel %vm874_vm8, %v864_v0, %v897_v38 }
 0x292   : > { %v899_v37 = vsel %vm876_vm9, %v865_v7, %v898_v29 }
 0x293   : > { %v900_v34 = vsel %vm878_vm10, %v866_v9, %v899_v37 }
 0x294   : > { %v915_v16 = vsel %vm905_vm11, %v900_v34, 0.0  ;;  %1246 = vset.pattern.permute.xlu1 %v1366_v40 }
 0x295   : > { %916 = vadd.xlane.f32.xlu2 %v915_v16 }
 0x296   : > { %v810_v1 = vpop.permute.xlu1 %809 }
 0x297   : > { %v858_v42 = vperm.slane %v810_v1, %v1639_v56 }
 0x299   : > { %v893_v35 = vsel %vm878_vm10, %v858_v42, %v892_v33 }
 0x29a   : > { %v912_v36 = vsel %vm905_vm11, %v893_v35, 0.0 }
 0x29b   : > { %913 = vadd.xlane.f32.xlu0 %v912_v36 }
 0x2ad   : > { %936 = vperm.xlu2 %1243, %v1636_v54  }
 0x2af   : > { %930 = vperm.xlu0 %1242, %v1636_v54  }
 0x2b5   : > { %1245 = vset.pattern.permute.xlu2 %v1366_v40 }
 0x2b7   : > { %1247 = vset.pattern.permute.xlu0 %v1366_v40 }
 0x2cf   : > { %v908_v41 = vpop.xlane.xlu2 %907 }
 0x2d0   : > { %v948_v51 = vadd.f32 %v1712_v50, %v908_v41 }
 0x2d2   : > { %v1162_v45 = vmul.f32 -1.442695, %v948_v51 }
 0x2d4   : > { %1250 = vpow2.f32 %v1162_v45 }
 0x2da   : > { %v1251_v56 = vpop.eup %1250 }
 0x2db   : > { %v964_v44 = vadd.f32 1.0, %v1251_v56 }
 0x2dd   : > { %1252 = vrcp.f32 %v964_v44  ;;  %v979_v49 = vand.u32 2147483648, %v964_v44  ;;  %v977_v48 = vand.u32 2147483647, %v964_v44  ;;  %vm973_vm13 = vweird.f32 %v964_v44 }
 0x2df   : > { %v980_v52 = vor.u32 1.1754944e-38, %v979_v49  ;;  %vm978_vm15 = vcmp.eq.f32.partialorder %v977_v48, 8.507059e+37 }
 0x2e3   : > { %v1253_v46 = vpop.eup %1252 }
 0x2e4   : > { %v969_v39 = vmul.f32 %v1253_v46, %v964_v44  ;;  %vm974_vm12 = vweird.f32 %v1253_v46 }
 0x2e5   : > { %vm975_vm14 = vmor %vm973_vm13, %vm974_vm12 }
 0x2e6   : > { %v970_v47 = vsub.f32 1.0, %v969_v39  ;;  %v911_v50 = vpop.xlane.xlu1 %910 }
 0x2e8   : > { %v971_v57 = vmul.f32 %v1253_v46, %v970_v47 }
 0x2ea   : > { %v972_v54 = vadd.f32 %v1253_v46, %v971_v57 }
 0x2ec   : > { %v976_v40 = vsel %vm975_vm14, %v1253_v46, %v972_v54 }
 0x2ed   : > { %v981_v53 = vsel %vm978_vm15, %v980_v52, %v976_v40 }
 0x2ee   : > { %1030 = vperm.xlu2 %1245, %v981_v53  }
 0x2fe   : > { %v943_v55 = vpop.permute.xlu1 %942 }
 0x308   : > { %v917_v58 = vpop.xlane.xlu2 %916 }
 0x309   : > { %v951_v59 = vadd.f32 %v943_v55, %v917_v58 }
 0x30b   : > { %v1165_v30 = vmul.f32 -1.442695, %v951_v59 }
 0x30d   : > { %1254 = vpow2.f32 %v1165_v30 }
 0x30e   : > { %v914_v18 = vpop.xlane.xlu0 %913 }
 0x310   : > { %v937_v60 = vpop.permute.xlu2 %936 }
 0x311   : > { %v950_v3 = vadd.f32 %v937_v60, %v914_v18 }
 0x313   : > { %v1255_v27 = vpop.eup %1254  ;;  %v1164_v2 = vmul.f32 -1.442695, %v950_v3 }
 0x314   : > { %v967_v20 = vadd.f32 1.0, %v1255_v27 }
 0x315   : > { %1256 = vpow2.f32 %v1164_v2 }
 0x316   : > { %1258 = vrcp.f32 %v967_v20  ;;  %v1024_v62 = vand.u32 2147483648, %v967_v20  ;;  %v1022_v63 = vand.u32 2147483647, %v967_v20  ;;  %vm1018_vm1 = vweird.f32 %v967_v20 }
 0x318   : > { %v1025_v7 = vor.u32 1.1754944e-38, %v1024_v62  ;;  %vm1023_vm3 = vcmp.eq.f32.partialorder %v1022_v63, 8.507059e+37 }
 0x31b   : > { %v1257_v61 = vpop.eup %1256 }
 0x31c   : > { %v1259_v19 = vpop.eup %1258  ;;  %v966_v21 = vadd.f32 1.0, %v1257_v61 }
 0x31d   : > { %v1014_v22 = vmul.f32 %v1259_v19, %v967_v20  ;;  %vm1019_vm0 = vweird.f32 %v1259_v19 }
 0x31e   : > { %1260 = vrcp.f32 %v966_v21  ;;  %vm1020_vm2 = vmor %vm1018_vm1, %vm1019_vm0  ;;  %v1009_v10 = vand.u32 2147483648, %v966_v21  ;;  %v1007_v11 = vand.u32 2147483647, %v966_v21  ;;  %vm1003_vm5 = vweird.f32 %v966_v21 }
 0x31f   : > { %v1015_v28 = vsub.f32 1.0, %v1014_v22 }
 0x320   : > { %v1010_v17 = vor.u32 1.1754944e-38, %v1009_v10  ;;  %vm1008_vm7 = vcmp.eq.f32.partialorder %v1007_v11, 8.507059e+37 }
 0x321   : > { %v931_v23 = vpop.permute.xlu0 %930  ;;  %v1016_v24 = vmul.f32 %v1259_v19, %v1015_v28 }
 0x322   : > { %v949_v32 = vadd.f32 %v931_v23, %v911_v50 }
 0x323   : > { %v1017_v26 = vadd.f32 %v1259_v19, %v1016_v24 }
 0x324   : > { %v1261_v25 = vpop.eup %1260  ;;  %v1163_v0 = vmul.f32 -1.442695, %v949_v32 }
 0x325   : > { %v1021_v38 = vsel %vm1020_vm2, %v1259_v19, %v1017_v26  ;;  %v999_v31 = vmul.f32 %v1261_v25, %v966_v21  ;;  %vm1004_vm4 = vweird.f32 %v1261_v25 }
 0x326   : > { %1262 = vpow2.f32 %v1163_v0  ;;  %v1026_v9 = vsel %vm1023_vm3, %v1025_v7, %v1021_v38  ;;  %vm1005_vm6 = vmor %vm1003_vm5, %vm1004_vm4 }
 0x327   : > { %1045 = vperm.xlu0 %1247, %v1026_v9   ;;  %v1000_v29 = vsub.f32 1.0, %v999_v31 }
 0x329   : > { %v1001_v37 = vmul.f32 %v1261_v25, %v1000_v29 }
 0x32b   : > { %v1002_v34 = vadd.f32 %v1261_v25, %v1001_v37 }
 0x32c   : > { %v1263_v16 = vpop.eup %1262 }
 0x32d   : > { %v965_v43 = vadd.f32 1.0, %v1263_v16  ;;  %v1006_v1 = vsel %vm1005_vm6, %v1261_v25, %v1002_v34 }
 0x32e   : > { %v1011_v42 = vsel %vm1008_vm7, %v1010_v17, %v1006_v1 }
 0x32f   : > { %1264 = vrcp.f32 %v965_v43  ;;  %1040 = vperm.xlu2 %1245, %v1011_v42   ;;  %v994_v41 = vand.u32 2147483648, %v965_v43  ;;  %v992_v45 = vand.u32 2147483647, %v965_v43  ;;  %vm988_vm9 = vweird.f32 %v965_v43 }
 0x331   : > { %v995_v44 = vor.u32 1.1754944e-38, %v994_v41  ;;  %vm993_vm11 = vcmp.eq.f32.partialorder %v992_v45, 8.507059e+37 }
 0x335   : > { %v1265_v33 = vpop.eup %1264 }
 0x336   : > { %v984_v35 = vmul.f32 %v1265_v33, %v965_v43  ;;  %vm989_vm8 = vweird.f32 %v1265_v33 }
 0x337   : > { %vm990_vm10 = vmor %vm988_vm9, %vm989_vm8 }
 0x338   : > { %v985_v36 = vsub.f32 1.0, %v984_v35 }
 0x33a   : > { %v986_v51 = vmul.f32 %v1265_v33, %v985_v36 }
 0x33c   : > { %v987_v56 = vadd.f32 %v1265_v33, %v986_v51 }
 0x33e   : > { %v991_v46 = vsel %vm990_vm10, %v1265_v33, %v987_v56 }
 0x33f   : > { %v996_v39 = vsel %vm993_vm11, %v995_v44, %v991_v46 }
 0x340   : > { %1035 = vperm.xlu1 %1246, %v996_v39  }
 0x348   : > { %v1031_v47 = vpop.permute.xlu2 %1030 }
 0x349   : > { %v1048_v49 = vmul.f32 %v1031_v47, %v1511_v6  ;;  %v1049_v57 = vmul.f32 %v1031_v47, %v1515_v8 }
 0x34b   : > { %1056 = vst [vmem:[%s244_s29] sm:$0xff] %v1048_v49 }
 0x34c   : > { %1057 = vst [vmem:[%s244_s29 + $0x8] sm:$0xff] %v1049_v57 }
 0x389   : > { %v1041_v48 = vpop.permute.xlu2 %1040 }
 0x38a   : > { %v1052_v54 = vmul.f32 %v1041_v48, %v1507_v4  ;;  %v1053_v52 = vmul.f32 %v1041_v48, %v1509_v5 }
 0x38c   : > { %1060 = vst [vmem:[%s244_s29 + $0x20] sm:$0xff] %v1052_v54 }
 0x38d   : > { %1061 = vst [vmem:[%s244_s29 + $0x28] sm:$0xff] %v1053_v52 }
 0x399   : > { %v1046_v40 = vpop.permute.xlu0 %1045 }
 0x39a   : > { %v1054_v53 = vmul.f32 %v1046_v40, %v1522_v12  ;;  %v1055_v50 = vmul.f32 %v1046_v40, %v1524_v13 }
 0x39c   : > { %1062 = vst [vmem:[%s244_s29 + $0x30] sm:$0xff] %v1054_v53 }
 0x39d   : > { %1063 = vst [vmem:[%s244_s29 + $0x38] sm:$0xff] %v1055_v50 }
 0x3b2   : > { %v1036_v4 = vpop.permute.xlu1 %1035 }
 0x3b3   : > { %v1050_v5 = vmul.f32 %v1036_v4, %v1526_v14  ;;  %v1051_v6 = vmul.f32 %v1036_v4, %v1528_v15 }
 0x3b5   : > { %1058 = vst [vmem:[%s244_s29 + $0x10] sm:$0xff] %v1050_v5 }
 0x3b6   : > { %1059 = vst [vmem:[%s244_s29 + $0x18] sm:$0xff] %v1051_v6 }
 0x3b7   : > { %1323 = shalt.err (!%p1320_p4)
}
 0x3b8   : > { %s1367_s12 = smov 256   ;;  %s1368_s25 = smov 16  }
 0x3b9   : > { %1175 = dma.vmem_to_hbm [thread:$0]  (%p1449_p11), %s1078_s17, 1024, %s1080_s26, %s1065_s8, %s1367_s12, %s1367_s12, %s1368_s25  }
 0x3ba PF: > { %s1094_s29 = sand.u32 1, %s1350_s18   ;;  %p1839_p7 = scmp.ge.s32.totalorder %s1362_s21, 2 }
 0x3bb   : > { %s1095_s13 = scalar_lea.sflag [#allocation4], %s1094_s29 }
 0x3bc   : > { %p1182_p5 = pnand %p1839_p7, %p1453_p12 }
 0x3be   : > { %p1183_p8 = pneg %p1182_p5 }
 0x3c0   : > { %1345 = dma.done.wait (%p1183_p8), %s1095_s13, 1024  }
 0x3c1   : > { %1347 = vsyncadd (%p1183_p8), %s1095_s13, 4294966272  ;;  %p18_p10 = scmp.ge.s32.totalorder %s1424_s24, 4   ;;  %s1840_s18 = smov %s1354_s19 }
 0x3c2   : > { %s1841_s19 = smov %s1358_s20  ;;  %s1842_s20 = smov %s1436_s27 }
 0x3c3   : > { %s1843_s21 = smov %s1424_s24  ;;  %20 = sbr.rel (!%p18_p10) target bundleno = 5 (0x5), region = 85 }
 0x3c8   :  { %1101 = vsyncpa [#allocation3], 1 }
 0x3c9   :  { %1103 = vsyncpa [#allocation3 + $0x1], 1 }
 0x3ca   :  { %1104 = vsyncpa [#allocation4], 1 }
 0x3cb   :  { %1106 = vsyncpa [#allocation4 + $0x1], 1 }

</bundles_post_ra>
